<compile_context>
chip_gen: v7x
topology: tpu7x:2x2x1
jax: 0.10.0
libtpu: 0.0.40
codegen_flags: <defaults>
</compile_context>

<pallas_src>
import numpy as np
import jax
import jax.numpy as jnp
from jax.experimental import pallas as pl
from jax.experimental.pallas import tpu as pltpu

SUBLANE = 8
DEFAULT_TILE_B = 4096   # rows per grid step (swept range 4096-8192 per review)


def _round_up(x, m):
    return ((x + m - 1) // m) * m


def _mlp_gaussian_kernel(x_ref, w1_ref, w2_ref, w3_ref,
                         b1_ref, b2_ref, b3_ref, mu_ref):
    """x_ref: [tb, state_dim] f32; w*: [in, out] f32; b*: [1, out] f32;
    mu_ref: [tb, action_dim] f32."""
    x = x_ref[...].astype(jnp.float32)

    # fc1 + tanh
    h1 = jnp.dot(x, w1_ref[...], preferred_element_type=jnp.float32)
    h1 = jnp.tanh(h1 + b1_ref[...])

    # fc2 + tanh
    h2 = jnp.dot(h1, w2_ref[...], preferred_element_type=jnp.float32)
    h2 = jnp.tanh(h2 + b2_ref[...])

    # fc3 + sigmoid (narrow: only action_dim columns ever computed/stored)
    h3 = jnp.dot(h2, w3_ref[...], preferred_element_type=jnp.float32)
    mu_ref[...] = jax.nn.sigmoid(h3 + b3_ref[...])


def mlp_gaussian_forward(state, params, *, tile_b=DEFAULT_TILE_B):
    """state: [B, state_dim] float.  Returns mu: [B, action_dim] f32."""
    w1, w2, w3 = params["w1"], params["w2"], params["w3"]
    b1, b2, b3 = params["b1"], params["b2"], params["b3"]

    B, state_dim = state.shape
    action_dim = w3.shape[1]

    # Sublane-aligned batch tile; cap at ~ceil(B/2) so the grid has >=2 steps
    # whenever the batch allows it (keeps both v7x TensorCores busy).
    tb = min(tile_b, _round_up(pl.cdiv(B, 2), SUBLANE))
    tb = max(tb, SUBLANE)
    grid = (pl.cdiv(B, tb),)   # ragged last block handled by Pallas; no jnp.pad

    grid_spec = pltpu.PrefetchScalarGridSpec(
        num_scalar_prefetch=0,
        grid=grid,
        in_specs=[
            # streamed per grid step (double-buffered by Pallas)
            pl.BlockSpec((tb, state_dim), lambda i: (i, 0)),
            # VMEM-resident parameters (constant block index, full-array blocks)
            pl.BlockSpec(w1.shape, lambda i: (0, 0)),
            pl.BlockSpec(w2.shape, lambda i: (0, 0)),
            pl.BlockSpec(w3.shape, lambda i: (0, 0)),
            pl.BlockSpec(b1.shape, lambda i: (0, 0)),
            pl.BlockSpec(b2.shape, lambda i: (0, 0)),
            pl.BlockSpec(b3.shape, lambda i: (0, 0)),
        ],
        out_specs=pl.BlockSpec((tb, action_dim), lambda i: (i, 0)),
    )

    mu = pl.pallas_call(
        _mlp_gaussian_kernel,
        out_shape=jax.ShapeDtypeStruct((B, action_dim), jnp.float32),
        grid_spec=grid_spec,
        compiler_params=pltpu.CompilerParams(
            dimension_semantics=("parallel",)),
    )(state, w1, w2, w3, b1, b2, b3)

    return mu


def _orthogonal(key, out_features, in_features, gain):
    """Deterministic orthogonal init (mirrors nn.init.orthogonal_), returns
    the PyTorch-layout [out, in] matrix."""
    rows, cols = out_features, in_features
    flat = jax.random.normal(key, (max(rows, cols), min(rows, cols)),
                             dtype=jnp.float32)
    q, r = jnp.linalg.qr(flat)
    d = jnp.sign(jnp.diag(r))
    q = q * d[None, :]
    if rows < cols:
        q = q.T
    return gain * q[:rows, :cols]


def init_mlp_gaussian_params(key, state_dim, fc1_dim, fc2_dim, action_dim):
    k1, k2, k3 = jax.random.split(key, 3)
    gain = float(np.sqrt(2.0))
    # PyTorch Linear weight is [out, in]; store transposed [in, out] for x @ w.
    w1 = _orthogonal(k1, fc1_dim, state_dim, gain).T
    w2 = _orthogonal(k2, fc2_dim, fc1_dim, gain).T
    w3 = _orthogonal(k3, action_dim, fc2_dim, gain).T

    # Module initializes biases to 0.0; kept as explicit (1, out) f32 buffers
    # so non-zero biases (e.g. from a trained checkpoint) also work.
    b1 = jnp.zeros((1, fc1_dim), jnp.float32)
    b2 = jnp.zeros((1, fc2_dim), jnp.float32)
    b3 = jnp.zeros((1, action_dim), jnp.float32)

    return {
        "w1": w1.astype(jnp.float32),
        "w2": w2.astype(jnp.float32),
        "w3": w3.astype(jnp.float32),
        "b1": b1, "b2": b2, "b3": b3,
    }


def _reference_forward(state, params):
    """Plain f32 JAX reference (mirrors the PyTorch module)."""
    hp = jax.lax.Precision.HIGHEST
    x = state.astype(jnp.float32)
    h1 = jnp.tanh(jnp.dot(x, params["w1"], precision=hp) + params["b1"])
    h2 = jnp.tanh(jnp.dot(h1, params["w2"], precision=hp) + params["b2"])
    return jax.nn.sigmoid(jnp.dot(h2, params["w3"], precision=hp) + params["b3"])


if __name__ == "__main__":
    # Small shapes consistent with the module's constructor.
    state_dim, fc1_dim, fc2_dim, action_dim = 16, 32, 32, 8

    key = jax.random.PRNGKey(0)
    k_state, k_state2, k_params = jax.random.split(key, 3)
    params = init_mlp_gaussian_params(k_params, state_dim, fc1_dim,
                                      fc2_dim, action_dim)

    # --- Check 1: tiny batch (single grid step) ---
    batch = 8
    state = jax.random.normal(k_state, (batch, state_dim), dtype=jnp.float32)
    mu = jax.block_until_ready(mlp_gaussian_forward(state, params))
    mu_ref = jax.block_until_ready(_reference_forward(state, params))
    assert mu.shape == (batch, action_dim)
    np.testing.assert_allclose(np.asarray(mu), np.asarray(mu_ref),
                               rtol=1e-4, atol=1e-5)

    # --- Check 2: non-divisible batch with a multi-step grid (exercises the
    #     cdiv/ragged-last-block path and the pipelined/parallel batch loop) ---
    batch2 = 40
    state2 = jax.random.normal(k_state2, (batch2, state_dim), dtype=jnp.float32)
    mu2 = jax.block_until_ready(mlp_gaussian_forward(state2, params, tile_b=16))
    mu2_ref = jax.block_until_ready(_reference_forward(state2, params))
    assert mu2.shape == (batch2, action_dim)
    np.testing.assert_allclose(np.asarray(mu2), np.asarray(mu2_ref),
                               rtol=1e-4, atol=1e-5)

    print("KERNEL_OK")
</pallas_src>

<mosaic_0001>
module attributes {stable_mosaic.version = 11 : i64} {
  func.func @_mlp_gaussian_kernel(%arg0: i32, %arg1: memref<8x16xf32, #tpu.memory_space<vmem>>, %arg2: memref<16x32xf32, #tpu.memory_space<vmem>>, %arg3: memref<32x32xf32, #tpu.memory_space<vmem>>, %arg4: memref<32x8xf32, #tpu.memory_space<vmem>>, %arg5: memref<1x32xf32, #tpu.memory_space<vmem>>, %arg6: memref<1x32xf32, #tpu.memory_space<vmem>>, %arg7: memref<1x8xf32, #tpu.memory_space<vmem>>, %arg8: memref<8x8xf32, #tpu.memory_space<vmem>>) attributes {dimension_semantics = [#tpu.dimension_semantics<parallel>], iteration_bounds = array<i64: 1>, scalar_prefetch = 0 : i64, scratch_operands = 0 : i64, tpu.core_type = #tpu.core_type<tc>, window_params = [{transform_indices = @transform_0, window_bounds = array<i64: 8, 16>}, {pipeline_mode = #tpu.pipeline_mode<synchronous>, transform_indices = @transform_1, window_bounds = array<i64: 16, 32>}, {pipeline_mode = #tpu.pipeline_mode<synchronous>, transform_indices = @transform_2, window_bounds = array<i64: 32, 32>}, {pipeline_mode = #tpu.pipeline_mode<synchronous>, transform_indices = @transform_3, window_bounds = array<i64: 32, 8>}, {pipeline_mode = #tpu.pipeline_mode<synchronous>, transform_indices = @transform_4, window_bounds = array<i64: 1, 32>}, {pipeline_mode = #tpu.pipeline_mode<synchronous>, transform_indices = @transform_5, window_bounds = array<i64: 1, 32>}, {pipeline_mode = #tpu.pipeline_mode<synchronous>, transform_indices = @transform_6, window_bounds = array<i64: 1, 8>}, {transform_indices = @transform_7, window_bounds = array<i64: 8, 8>}]} {
    %c0 = arith.constant 0 : index
    %c0_0 = arith.constant 0 : index
    %0 = vector.load %arg1[%c0, %c0_0] : memref<8x16xf32, #tpu.memory_space<vmem>>, vector<8x16xf32>
    %c0_1 = arith.constant 0 : index
    %c0_2 = arith.constant 0 : index
    %1 = vector.load %arg2[%c0_1, %c0_2] : memref<16x32xf32, #tpu.memory_space<vmem>>, vector<16x32xf32>
    %cst = arith.constant dense<0.000000e+00> : vector<8x32xf32>
    %2 = tpu.matmul %0, %1, %cst {dimension_numbers = #tpu.dot_dimension_numbers<[1], [0], [0], [1], [0, 0, 1, 1], [], []>} : vector<8x16xf32>, vector<16x32xf32>, vector<8x32xf32> -> vector<8x32xf32>
    %c0_3 = arith.constant 0 : index
    %c0_4 = arith.constant 0 : index
    %3 = vector.load %arg5[%c0_3, %c0_4] : memref<1x32xf32, #tpu.memory_space<vmem>>, vector<1x32xf32>
    %4 = vector.broadcast %3 : vector<1x32xf32> to vector<8x32xf32>
    %5 = arith.addf %2, %4 : vector<8x32xf32>
    %6 = math.tanh %5 : vector<8x32xf32>
    %c0_5 = arith.constant 0 : index
    %c0_6 = arith.constant 0 : index
    %7 = vector.load %arg3[%c0_5, %c0_6] : memref<32x32xf32, #tpu.memory_space<vmem>>, vector<32x32xf32>
    %cst_7 = arith.constant dense<0.000000e+00> : vector<8x32xf32>
    %8 = tpu.matmul %6, %7, %cst_7 {dimension_numbers = #tpu.dot_dimension_numbers<[1], [0], [0], [1], [0, 0, 1, 1], [], []>} : vector<8x32xf32>, vector<32x32xf32>, vector<8x32xf32> -> vector<8x32xf32>
    %c0_8 = arith.constant 0 : index
    %c0_9 = arith.constant 0 : index
    %9 = vector.load %arg6[%c0_8, %c0_9] : memref<1x32xf32, #tpu.memory_space<vmem>>, vector<1x32xf32>
    %10 = vector.broadcast %9 : vector<1x32xf32> to vector<8x32xf32>
    %11 = arith.addf %8, %10 : vector<8x32xf32>
    %12 = math.tanh %11 : vector<8x32xf32>
    %c0_10 = arith.constant 0 : index
    %c0_11 = arith.constant 0 : index
    %13 = vector.load %arg4[%c0_10, %c0_11] : memref<32x8xf32, #tpu.memory_space<vmem>>, vector<32x8xf32>
    %cst_12 = arith.constant dense<0.000000e+00> : vector<8x8xf32>
    %14 = tpu.matmul %12, %13, %cst_12 {dimension_numbers = #tpu.dot_dimension_numbers<[1], [0], [0], [1], [0, 0, 1, 1], [], []>} : vector<8x32xf32>, vector<32x8xf32>, vector<8x8xf32> -> vector<8x8xf32>
    %c0_13 = arith.constant 0 : index
    %c0_14 = arith.constant 0 : index
    %15 = vector.load %arg7[%c0_13, %c0_14] : memref<1x8xf32, #tpu.memory_space<vmem>>, vector<1x8xf32>
    %16 = vector.broadcast %15 : vector<1x8xf32> to vector<8x8xf32>
    %17 = arith.addf %14, %16 : vector<8x8xf32>
    %18 = arith.negf %17 : vector<8x8xf32>
    %19 = math.exp %18 : vector<8x8xf32>
    %cst_15 = arith.constant 1.000000e+00 : f32
    %20 = vector.broadcast %cst_15 : f32 to vector<8x8xf32>
    %21 = arith.addf %20, %19 : vector<8x8xf32>
    %22 = arith.divf %20, %21 : vector<8x8xf32>
    %c0_16 = arith.constant 0 : index
    %c0_17 = arith.constant 0 : index
    %23 = vector.load %arg8[%c0_16, %c0_17] : memref<8x8xf32, #tpu.memory_space<vmem>>, vector<8x8xf32>
    tpu.vector_store %arg8[%c0_16, %c0_17], %22 {strides = array<i32>} : memref<8x8xf32, #tpu.memory_space<vmem>>, vector<8x8xf32>,
    return
  }
  func.func @transform_0(%arg0: i32) -> (i32, i32) {
    %c0_i32 = arith.constant 0 : i32
    %c0_i32_0 = arith.constant 0 : i32
    return %arg0, %c0_i32 : i32, i32
  }
  func.func @transform_1(%arg0: i32) -> (i32, i32) {
    %c0_i32 = arith.constant 0 : i32
    %c0_i32_0 = arith.constant 0 : i32
    %c0_i32_1 = arith.constant 0 : i32
    return %c0_i32, %c0_i32_0 : i32, i32
  }
  func.func @transform_2(%arg0: i32) -> (i32, i32) {
    %c0_i32 = arith.constant 0 : i32
    %c0_i32_0 = arith.constant 0 : i32
    %c0_i32_1 = arith.constant 0 : i32
    return %c0_i32, %c0_i32_0 : i32, i32
  }
  func.func @transform_3(%arg0: i32) -> (i32, i32) {
    %c0_i32 = arith.constant 0 : i32
    %c0_i32_0 = arith.constant 0 : i32
    %c0_i32_1 = arith.constant 0 : i32
    return %c0_i32, %c0_i32_0 : i32, i32
  }
  func.func @transform_4(%arg0: i32) -> (i32, i32) {
    %c0_i32 = arith.constant 0 : i32
    %c0_i32_0 = arith.constant 0 : i32
    %c0_i32_1 = arith.constant 0 : i32
    return %c0_i32, %c0_i32_0 : i32, i32
  }
  func.func @transform_5(%arg0: i32) -> (i32, i32) {
    %c0_i32 = arith.constant 0 : i32
    %c0_i32_0 = arith.constant 0 : i32
    %c0_i32_1 = arith.constant 0 : i32
    return %c0_i32, %c0_i32_0 : i32, i32
  }
  func.func @transform_6(%arg0: i32) -> (i32, i32) {
    %c0_i32 = arith.constant 0 : i32
    %c0_i32_0 = arith.constant 0 : i32
    %c0_i32_1 = arith.constant 0 : i32
    return %c0_i32, %c0_i32_0 : i32, i32
  }
  func.func @transform_7(%arg0: i32) -> (i32, i32) {
    %c0_i32 = arith.constant 0 : i32
    %c0_i32_0 = arith.constant 0 : i32
    return %arg0, %c0_i32 : i32, i32
  }
}

</mosaic_0001>

<bundles_post_ra>
// kernel: tpu_custom_call.1
= control target key start
LH: loop header
LB: loop body
LE: loop exit
PB: predicated region body
PF: predicated region fallthrough
CT: control target
= control target key end

     0   :  { %12 = vsyncpa [#allocation3], 0  ;;  %s555_s0 = inlined_call_operand.vmem [shape: f32[8,16], index: 0, kind: input, shape index: {}]   ;;  %s556_s1 = inlined_call_operand.hbm [shape: f32[16,32], index: 1, kind: input, shape index: {}]   ;;  %s557_s2 = inlined_call_operand.vmem [shape: f32[32,32], index: 2, kind: input, shape index: {}]   ;;  %s558_s3 = inlined_call_operand.vmem [shape: f32[32,8], index: 3, kind: input, shape index: {}]   ;;  %s559_s4 = inlined_call_operand.vmem [shape: f32[1,32], index: 4, kind: input, shape index: {}]   ;;  %s560_s5 = inlined_call_operand.vmem [shape: f32[1,32], index: 5, kind: input, shape index: {}]   ;;  %s561_s6 = inlined_call_operand.vmem [shape: f32[1,8], index: 6, kind: input, shape index: {}]   ;;  %s562_s7 = inlined_call_operand.hbm [shape: f32[8,8], index: 7, kind: output, shape index: {}]  }
   0x1   :  { %13 = vsyncpa [#allocation4], 0  ;;  %s446_s24 = smov [#allocation2]   ;;  %s398_s28 = scalar_lea.hbm %s556_s1, 256 }
   0x2   :  { %s21_s25 = sshll.u32 %s446_s24, 4  ;;  %p399_p0 = scmp.ne.s32.totalorder %s556_s1, %s398_s28  ;;  %s22_s25 = int_to_ptr.vmem [resolvable:$true] %s21_s25 }
   0x3   :  { %p402_p1 = scmp.lt.u32.totalorder %s398_s28, %s556_s1 }
   0x5   :  { %p404_p2 = pnand %p402_p1, %p399_p0 }
   0x7   :  { %407 = shalt.err (!%p404_p2)
}
   0x8   :  { %s408_s10 = scalar_lea.vmem %s22_s25, 256  ;;  %p413_p4 = scmp.lt.s32.totalorder %s22_s25, %s22_s25 }
   0x9   :  { %p409_p3 = scmp.ne.s32.totalorder %s22_s25, %s408_s10  ;;  %p414_p5 = scmp.lt.s32.totalorder %s408_s10, %s408_s10 }
   0xb   :  { %p415_p6 = por %p414_p5, %p413_p4 }
   0xd   :  { %p416_p7 = pnand %p415_p6, %p409_p3 }
   0xf   :  { %419 = shalt.err (!%p416_p7)
}
  0x10   :  { %s447_s11 = smov 128   ;;  %s448_s12 = smov 8  }
  0x11   :  { %27 = dma.hbm_to_vmem [thread:$0]  %s556_s1, 256, %s22_s25, [#allocation3], %s447_s11, %s447_s11, %s448_s12  }
  0x12   :  { %442 = dma.done.wait [#allocation3], 256  }
  0x13   :  { %443 = vsyncadd [#allocation3], 4294967040  ;;  %v449_v0 = vmov 0.0|0.0   ;;  %vm450_vm0 = vmmov 0   ;;  %v451_v1 = vmov 0.0   ;;  %v42_v2 = vld [vmem:[#allocation2] sm:$0xff] }
  0x14   :  { %368 = vmatprep.subr.bf16.mxu0 %v449_v0  ;;  %343 = vmatprep.mubr.msk.f32.mxu0 %vm450_vm0, %v451_v1  ;;  %v43_v3 = vld [vmem:[#allocation2 + $0x8] sm:$0xff]  ;;  %v41_v5 = vld [vmem:[%s555_s0] sm:$0xff]  ;;  %vm51_vm1 = vcmask 130048   ;;  %v128_v8 = vld [vmem:[%s557_s2 + $0x10] sm:$0xff]  ;;  %vm137_vm2 = vcmask 261120   ;;  %vm302_vm3 = vcmask 64512  }
  0x15   :  { %371 = vmatprep.subr.bf16.mxu1 %v449_v0  ;;  %354 = vmatprep.mubr.msk.f32.mxu1 %vm450_vm0, %v451_v1  ;;  %v369_v4 = vpack.c.bf16 %v43_v3, %v42_v2  ;;  %v126_v6 = vld [vmem:[%s557_s2] sm:$0xff]  ;;  %v127_v7 = vld [vmem:[%s557_s2 + $0x8] sm:$0xff]  ;;  %v129_v10 = vld [vmem:[%s557_s2 + $0x18] sm:$0xff] }
  0x16   :  { %v372_v9 = vpack.c.bf16 %v127_v7, %v126_v6  ;;  %v375_v11 = vpack.c.bf16 %v129_v10, %v128_v8  ;;  %v319_v12 = vld [vmem:[%s559_s4] ss:$0 sm:$0xff]  ;;  %v213_v18 = vld [vmem:[%s558_s3 + $0x8] sm:$0xff]  ;;  %v214_v19 = vld [vmem:[%s558_s3 + $0x10] sm:$0xff] }
  0x17   :  { %370 = vmatpush3.bf16.msra.mxu0 %v369_v4  ;;  %v212_v17 = vld [vmem:[%s558_s3] sm:$0xff]  ;;  %v215_v21 = vld [vmem:[%s558_s3 + $0x18] sm:$0xff]  ;;  %s452_s3 = smov [#allocation5]  }
  0x18   :  { %377 = vmatprep.subr.bf16.mxu0 %v449_v0  ;;  %373 = vmatpush3.bf16.msra.mxu1 %v372_v9  ;;  %v378_v20 = vpack.c.bf16 %v213_v18, %v212_v17  ;;  %v381_v22 = vpack.c.bf16 %v215_v21, %v214_v19  ;;  %v321_v23 = vld [vmem:[%s560_s5] ss:$0 sm:$0xff]  ;;  %s310_s5 = sshll.u32 %s452_s3, 4  ;;  %s311_s5 = int_to_ptr.vmem [resolvable:$true] %s310_s5 }
  0x19   :  { %374 = vmatprep.subr.bf16.mxu1 %v449_v0  ;;  %v323_v28 = vld [vmem:[%s561_s6] ss:$0 sm:$0xff]  ;;  %s420_s12 = scalar_lea.vmem %s311_s5, 128  ;;  %p425_p9 = scmp.lt.s32.totalorder %s311_s5, %s311_s5 }
  0x1a   :  { %344 = vmatmul.mubr.msk.f32.vlgmr.msra.gmra.mrb[0].mxu0 %vm51_vm1, %v41_v5  ;;  %p421_p8 = scmp.ne.s32.totalorder %s311_s5, %s420_s12  ;;  %p426_p10 = scmp.lt.s32.totalorder %s420_s12, %s420_s12 }
  0x1b   :  { %365 = vmatprep.mubr.msk.f32.mxu0 %vm450_vm0, %v451_v1  ;;  %379 = vmatpush3.bf16.msra.mxu0 %v378_v20 }
  0x1c   :  { %376 = vmatpush3.bf16.msra.mxu1 %v375_v11  ;;  %380 = vmatprep.subr.bf16.mxu0 %v449_v0  ;;  %p427_p11 = por %p426_p10, %p425_p9 }
  0x1e   :  { %p428_p12 = pnand %p427_p11, %p421_p8 }
  0x1f   :  { %382 = vmatpush3.bf16.msra.mxu0 %v381_v22 }
  0xed   :  { %v121_v13 = vpop.f32.mrb[0].mxu0 }
  0xee   :  { %v122_v14 = vadd.f32 %v319_v12, %v121_v13  ;;  %v345_v15 = vpop.f32.mrb[1].mxu0 }
  0xf0   :  { %390 = vtanh.f32 %v122_v14 }
  0xfa   :  { %v391_v16 = vpop.eup %390 }
  0xfb   :  { %355 = vmatmul.mubr.msk.f32.vlgmr.msra.gmra.mrb[0].mxu1 %vm137_vm2, %v391_v16 }
 0x1ce   :  { %v207_v24 = vpop.f32.mrb[0].mxu1 }
 0x1cf   :  { %v208_v25 = vadd.f32 %v321_v23, %v207_v24  ;;  %v356_v26 = vpop.f32.mrb[1].mxu1 }
 0x1d1   :  { %392 = vtanh.f32 %v208_v25 }
 0x1db   :  { %v393_v27 = vpop.eup %392 }
 0x1dc   :  { %366 = vmatmul.mubr.msk.f32.vlgmr.msra.gmra.mrb[2].mxu0 %vm137_vm2, %v393_v27 }
 0x2af   :  { %v292_v29 = vpop.f32.mrb[2].mxu0 }
 0x2b0   :  { %v293_v30 = vadd.f32 %v323_v28, %v292_v29  ;;  %v367_v31 = vpop.f32.mrb[3].mxu0 }
 0x2b2   :  { %v325_v32 = vmul.f32 -1.442695, %v293_v30 }
 0x2b4   :  { %394 = vpow2.f32 %v325_v32 }
 0x2be   :  { %v395_v33 = vpop.eup %394 }
 0x2bf   :  { %v299_v34 = vadd.f32 1.0, %v395_v33 }
 0x2c1   :  { %396 = vrcp.f32 %v299_v34 }
 0x2cb   :  { %v397_v35 = vpop.eup %396 }
 0x2cc   :  { %303 = vst.msk [vmem:[#allocation5] sm:$0xff] %vm302_vm3, %v397_v35 }
 0x2cd   :  { %431 = shalt.err (!%p428_p12)
}
 0x2ce   :  { %s432_s14 = scalar_lea.hbm %s562_s7, 128 }
 0x2cf   :  { %p433_p13 = scmp.ne.s32.totalorder %s562_s7, %s432_s14  ;;  %p436_p0 = scmp.lt.u32.totalorder %s432_s14, %s562_s7 }
 0x2d1   :  { %p438_p1 = pnand %p436_p0, %p433_p13 }
 0x2d3   :  { %441 = shalt.err (!%p438_p1)
}
 0x2d4   :  { %313 = dma.vmem_to_hbm [thread:$0]  %s311_s5, 128, %s562_s7, [#allocation4]  }
 0x2d5   :  { %444 = dma.done.wait [#allocation4], 128  }
 0x2d6   :  { %445 = vsyncadd [#allocation4], 4294967168 }
 0x2d7   :  { %317 = vsyncpa [#allocation3], 1 }
 0x2d8   :  { %318 = vsyncpa [#allocation4], 1 }

</bundles_post_ra>
